<compile_context>
chip_gen: v7x
topology: tpu7x:2x2x1
jax: 0.10.0
libtpu: 0.0.40
codegen_flags: <defaults>
</compile_context>

<pallas_src>
import functools
import math

import jax
import jax.numpy as jnp
from jax.experimental import pallas as pl
from jax.experimental.pallas import tpu as pltpu


# --------------------------------------------------------------------------
# Kernels
# --------------------------------------------------------------------------
def _pe_add_kernel(x_ref, pe_ref, o_ref):
    """Eval mode: out = x + pe (pe broadcast over the leading batch axis).

    x_ref : VMEM (B, TS, D)
    pe_ref: VMEM (TS, D)
    o_ref : VMEM (B, TS, D)
    """
    o_ref[...] = (x_ref[...] + pe_ref[...][None, :, :]).astype(o_ref.dtype)


def _pe_add_dropout_kernel(x_ref, pe_ref, bits_ref, o_ref, *, threshold, scale):
    """Train mode: out = inverted_dropout(x + pe).

    bits_ref: VMEM (B, TS, D) uint32 -- pre-generated random bits.
    keep iff bits >= threshold  (P[keep] = 1 - p), kept values scaled by 1/(1-p).
    """
    y = x_ref[...] + pe_ref[...][None, :, :]
    keep = bits_ref[...] >= jnp.uint32(threshold)
    o_ref[...] = jnp.where(keep, y * scale, jnp.zeros_like(y)).astype(o_ref.dtype)


# --------------------------------------------------------------------------
# PE table (identical to the PyTorch __init__, stored as (max_len, d_model))
# --------------------------------------------------------------------------
def make_positional_encoding_table(max_len: int, d_model: int, dtype=jnp.float32):
    position = jnp.arange(max_len, dtype=jnp.float32)[:, None]            # (max_len, 1)
    div_term = jnp.exp(
        jnp.arange(0, d_model, 2, dtype=jnp.float32) * (-math.log(10000.0) / d_model)
    )                                                                      # (d_model/2,)
    pe = jnp.zeros((max_len, d_model), dtype=jnp.float32)
    pe = pe.at[:, 0::2].set(jnp.sin(position * div_term))
    pe = pe.at[:, 1::2].set(jnp.cos(position * div_term))
    return pe.astype(dtype)


# --------------------------------------------------------------------------
# Tiling helper
# --------------------------------------------------------------------------
def _choose_seq_tile(seq_len: int, row_bytes: int, budget_bytes: int = 2 << 20) -> int:
    """Largest multiple-of-8 divisor of seq_len whose x-tile fits the budget.

    Falls back to a single full-extent block when seq_len is not a multiple
    of 8 (still satisfies the block-shape rule because it equals the full dim).
    """
    if seq_len % 8 != 0:
        return seq_len
    best = 8
    cand = 8
    while cand <= seq_len:
        if seq_len % cand == 0 and cand * row_bytes <= budget_bytes:
            best = cand
        cand += 8
    return best


# --------------------------------------------------------------------------
# Forward wrapper
# --------------------------------------------------------------------------
def positional_encoding_forward(x, pe_table, *, dropout_p=0.1, training=False, key=None):
    """x: (seq_len, batch, d_model); pe_table: (max_len, d_model), max_len >= seq_len."""
    S, B, D = x.shape
    assert pe_table.shape[0] >= S and pe_table.shape[1] == D

    # Layout plumbing: (S, B, D) -> (B, S, D) so blocks are (B, TS, D) with a
    # lane-dense last dim and seq on sublanes.
    xt = jnp.transpose(x, (1, 0, 2))
    pe = pe_table.astype(x.dtype)  # same dtype as x: halves pe DMA for bf16 inputs

    itemsize = jnp.dtype(x.dtype).itemsize
    ts = _choose_seq_tile(S, B * D * itemsize)
    grid = (S // ts,)

    if ts % 8 == 0:
        # Select pe rows directly from the full table via the index_map
        # (no wrapper-side slice copy of the table).
        pe_in = pe
        pe_spec = pl.BlockSpec((ts, D), lambda i: (i, 0))
    else:
        # Fallback (seq_len not a multiple of 8): single full-extent block.
        pe_in = pe[:S]
        pe_spec = pl.BlockSpec((ts, D), lambda i: (0, 0))

    x_spec = pl.BlockSpec((B, ts, D), lambda i: (0, i, 0))
    out_spec = pl.BlockSpec((B, ts, D), lambda i: (0, i, 0))

    compiler_params = pltpu.CompilerParams(
        dimension_semantics=("parallel",),        # independent tiles -> megacore on v7x
        vmem_limit_bytes=32 * 1024 * 1024,        # explicit budget (safe on v5e/v6e/v7x)
    )
    out_shape = jax.ShapeDtypeStruct((B, S, D), x.dtype)

    if training and dropout_p > 0.0:
        if key is None:
            key = jax.random.PRNGKey(0)
        # Pre-generated random bits; kernel does a pure uint32 compare.
        bits = jax.random.bits(key, (B, S, D), dtype=jnp.uint32)
        threshold = min(int(round(float(dropout_p) * (2 ** 32))), 2 ** 32 - 1)
        scale = 1.0 / (1.0 - float(dropout_p))
        kernel = functools.partial(
            _pe_add_dropout_kernel, threshold=threshold, scale=scale
        )
        ot = pl.pallas_call(
            kernel,
            out_shape=out_shape,
            grid=grid,
            in_specs=[x_spec, pe_spec, pl.BlockSpec((B, ts, D), lambda i: (0, i, 0))],
            out_specs=out_spec,
            compiler_params=compiler_params,
        )(xt, pe_in, bits)
    else:
        ot = pl.pallas_call(
            _pe_add_kernel,
            out_shape=out_shape,
            grid=grid,
            in_specs=[x_spec, pe_spec],
            out_specs=out_spec,
            compiler_params=compiler_params,
        )(xt, pe_in)

    # Back to the module's (seq_len, batch, d_model) convention.
    return jnp.transpose(ot, (1, 0, 2))


# --------------------------------------------------------------------------
# Self-test
# --------------------------------------------------------------------------
if __name__ == "__main__":
    # Small shapes consistent with the module: (seq_len, batch, d_model)
    seq_len, batch, d_model, max_len = 8, 2, 32, 16
    dropout_p = 0.1

    root = jax.random.PRNGKey(0)
    k_x, k_drop = jax.random.split(root)
    x = jax.random.normal(k_x, (seq_len, batch, d_model), dtype=jnp.float32)

    pe_table = make_positional_encoding_table(max_len, d_model)
    ref = x + pe_table[:seq_len][:, None, :]

    # Eval mode (dropout is identity): exact match against the plain-JAX reference.
    out_eval = positional_encoding_forward(
        x, pe_table, dropout_p=dropout_p, training=False
    )
    out_eval = jax.block_until_ready(out_eval)
    assert out_eval.shape == x.shape
    assert jnp.allclose(out_eval, ref, atol=1e-6), "eval-mode mismatch"

    # Train mode: every output element is either 0 (dropped) or ref * 1/(1-p).
    out_train = positional_encoding_forward(
        x, pe_table, dropout_p=dropout_p, training=True, key=k_drop
    )
    out_train = jax.block_until_ready(out_train)
    assert out_train.shape == x.shape
    scale = 1.0 / (1.0 - dropout_p)
    elem_ok = jnp.where(
        out_train == 0.0, True, jnp.isclose(out_train, ref * scale, atol=1e-5)
    )
    assert bool(elem_ok.all()), "train-mode dropout values inconsistent"

    print("KERNEL_OK")
</pallas_src>

<mosaic_0001>
module attributes {stable_mosaic.version = 11 : i64} {
  func.func @_pe_add_kernel(%arg0: i32, %arg1: memref<2x8x32xf32, #tpu.memory_space<vmem>>, %arg2: memref<8x32xf32, #tpu.memory_space<vmem>>, %arg3: memref<2x8x32xf32, #tpu.memory_space<vmem>>) attributes {dimension_semantics = [#tpu.dimension_semantics<parallel>], iteration_bounds = array<i64: 1>, scalar_prefetch = 0 : i64, scratch_operands = 0 : i64, tpu.core_type = #tpu.core_type<tc>, window_params = [{transform_indices = @transform_0, window_bounds = array<i64: 2, 8, 32>}, {transform_indices = @transform_1, window_bounds = array<i64: 8, 32>}, {transform_indices = @transform_2, window_bounds = array<i64: 2, 8, 32>}]} {
    %c0 = arith.constant 0 : index
    %c0_0 = arith.constant 0 : index
    %c0_1 = arith.constant 0 : index
    %0 = vector.load %arg1[%c0, %c0_0, %c0_1] : memref<2x8x32xf32, #tpu.memory_space<vmem>>, vector<2x8x32xf32>
    %c0_2 = arith.constant 0 : index
    %c0_3 = arith.constant 0 : index
    %1 = vector.load %arg2[%c0_2, %c0_3] : memref<8x32xf32, #tpu.memory_space<vmem>>, vector<8x32xf32>
    %2 = vector.shape_cast %1 : vector<8x32xf32> to vector<1x8x32xf32>
    %3 = vector.broadcast %2 : vector<1x8x32xf32> to vector<2x8x32xf32>
    %4 = arith.addf %0, %3 : vector<2x8x32xf32>
    %c0_4 = arith.constant 0 : index
    %c0_5 = arith.constant 0 : index
    %c0_6 = arith.constant 0 : index
    %5 = vector.load %arg3[%c0_4, %c0_5, %c0_6] : memref<2x8x32xf32, #tpu.memory_space<vmem>>, vector<2x8x32xf32>
    tpu.vector_store %arg3[%c0_4, %c0_5, %c0_6], %4 {strides = array<i32>} : memref<2x8x32xf32, #tpu.memory_space<vmem>>, vector<2x8x32xf32>,
    return
  }
  func.func @transform_0(%arg0: i32) -> (i32, i32, i32) {
    %c0_i32 = arith.constant 0 : i32
    %c0_i32_0 = arith.constant 0 : i32
    %c0_i32_1 = arith.constant 0 : i32
    return %c0_i32, %arg0, %c0_i32_0 : i32, i32, i32
  }
  func.func @transform_1(%arg0: i32) -> (i32, i32) {
    %c0_i32 = arith.constant 0 : i32
    %c0_i32_0 = arith.constant 0 : i32
    return %arg0, %c0_i32 : i32, i32
  }
  func.func @transform_2(%arg0: i32) -> (i32, i32, i32) {
    %c0_i32 = arith.constant 0 : i32
    %c0_i32_0 = arith.constant 0 : i32
    %c0_i32_1 = arith.constant 0 : i32
    return %c0_i32, %arg0, %c0_i32_0 : i32, i32, i32
  }
}

</mosaic_0001>

<bundles_post_ra>
// kernel: tpu_custom_call.1
= control target key start
LH: loop header
LB: loop body
LE: loop exit
PB: predicated region body
PF: predicated region fallthrough
CT: control target
= control target key end

     0   :  { %7 = vsyncpa [#allocation3], 0  ;;  %s206_s0 = inlined_call_operand.hbm [shape: f32[2,8,32], index: 0, kind: input, shape index: {}]   ;;  %s207_s1 = inlined_call_operand.hbm [shape: f32[16,32], index: 1, kind: input, shape index: {}]   ;;  %s208_s2 = inlined_call_operand.hbm [shape: f32[2,8,32], index: 2, kind: output, shape index: {}]  }
   0x1   :  { %8 = vsyncpa [#allocation6], 0 }
   0x2   :  { %9 = vsyncpa [#allocation4], 0  ;;  %s141_s9 = smov [#allocation2]   ;;  %s69_s13 = scalar_lea.hbm %s206_s0, 256 }
   0x3   :  { %s15_s10 = sshll.u32 %s141_s9, 4  ;;  %p70_p0 = scmp.ne.s32.totalorder %s206_s0, %s69_s13  ;;  %s16_s10 = int_to_ptr.vmem [resolvable:$true] %s15_s10 }
   0x4   :  { %p73_p1 = scmp.lt.u32.totalorder %s69_s13, %s206_s0 }
   0x6   :  { %p75_p2 = pnand %p73_p1, %p70_p0 }
   0x8   :  { %78 = shalt.err (!%p75_p2)
}
   0x9   :  { %s79_s18 = scalar_lea.vmem %s16_s10, 256  ;;  %p84_p4 = scmp.lt.s32.totalorder %s16_s10, %s16_s10 }
   0xa   :  { %p80_p3 = scmp.ne.s32.totalorder %s16_s10, %s79_s18  ;;  %p85_p5 = scmp.lt.s32.totalorder %s79_s18, %s79_s18 }
   0xc   :  { %p86_p6 = por %p85_p5, %p84_p4 }
   0xe   :  { %p87_p7 = pnand %p86_p6, %p80_p3 }
  0x10   :  { %90 = shalt.err (!%p87_p7)
}
  0x11   :  { %s142_s19 = smov 128   ;;  %s143_s20 = smov 8  }
  0x12   :  { %21 = dma.hbm_to_vmem [thread:$0]  %s206_s0, 256, %s16_s10, [#allocation3], %s142_s19, %s142_s19, %s143_s20  }
  0x13   :  { %s144_s23 = smov [#allocation5]   ;;  %s91_s27 = scalar_lea.hbm %s207_s1, 128 }
  0x14   :  { %s28_s24 = sshll.u32 %s144_s23, 4  ;;  %p92_p8 = scmp.ne.s32.totalorder %s207_s1, %s91_s27  ;;  %s29_s24 = int_to_ptr.vmem [resolvable:$true] %s28_s24 }
  0x15   :  { %s93_s4 = scalar_lea.hbm %s207_s1, 256  ;;  %p95_p10 = scmp.lt.u32.totalorder %s91_s27, %s207_s1 }
  0x16   :  { %p94_p9 = scmp.lt.u32.totalorder %s93_s4, %s91_s27 }
  0x18   :  { %p96_p11 = por %p95_p10, %p94_p9 }
  0x1a   :  { %p97_p12 = pnand %p96_p11, %p92_p8 }
  0x1c   :  { %100 = shalt.err (!%p97_p12)
}
  0x1d   :  { %s101_s0 = scalar_lea.vmem %s29_s24, 128  ;;  %p106_p0 = scmp.lt.s32.totalorder %s29_s24, %s29_s24 }
  0x1e   :  { %p102_p13 = scmp.ne.s32.totalorder %s29_s24, %s101_s0  ;;  %p107_p1 = scmp.lt.s32.totalorder %s101_s0, %s101_s0 }
  0x20   :  { %p108_p2 = por %p107_p1, %p106_p0 }
  0x22   :  { %p109_p3 = pnand %p108_p2, %p102_p13 }
  0x24   :  { %112 = shalt.err (!%p109_p3)
}
  0x25   :  { %31 = dma.hbm_to_vmem [thread:$0]  %s207_s1, 128, %s29_s24, [#allocation6]  }
  0x26   :  { %135 = dma.done.wait [#allocation3], 256  }
  0x27   :  { %136 = vsyncadd [#allocation3], 4294967040 }
  0x28   :  { %137 = dma.done.wait [#allocation6], 128  }
  0x29   :  { %138 = vsyncadd [#allocation6], 4294967168  ;;  %s145_s9 = smov [#allocation7]   ;;  %v38_v0 = vld [vmem:[#allocation2] sm:$0xff]  ;;  %v40_v1 = vld [vmem:[#allocation5] sm:$0xff]  ;;  %vm43_vm0 = vcmask 261120  }
  0x2a   :  { %s51_s10 = sshll.u32 %s145_s9, 4  ;;  %v39_v2 = vld [vmem:[#allocation2 + $0x8] sm:$0xff]  ;;  %v41_v3 = vadd.f32 %v40_v1, %v38_v0  ;;  %s52_s10 = int_to_ptr.vmem [resolvable:$true] %s51_s10 }
  0x2b   :  { %v42_v4 = vadd.f32 %v40_v1, %v39_v2  ;;  %s113_s11 = scalar_lea.vmem %s52_s10, 256  ;;  %p118_p5 = scmp.lt.s32.totalorder %s52_s10, %s52_s10 }
  0x2c   :  { %44 = vst.msk [vmem:[#allocation7] sm:$0xff] %vm43_vm0, %v41_v3  ;;  %p114_p4 = scmp.ne.s32.totalorder %s52_s10, %s113_s11  ;;  %p119_p6 = scmp.lt.s32.totalorder %s113_s11, %s113_s11 }
  0x2d   :  { %45 = vst.msk [vmem:[#allocation7 + $0x8] sm:$0xff] %vm43_vm0, %v42_v4 }
  0x2e   :  { %p120_p7 = por %p119_p6, %p118_p5 }
  0x30   :  { %p121_p8 = pnand %p120_p7, %p114_p4 }
  0x32   :  { %124 = shalt.err (!%p121_p8)
}
  0x33   :  { %s125_s13 = scalar_lea.hbm %s208_s2, 256 }
  0x34   :  { %p126_p9 = scmp.ne.s32.totalorder %s208_s2, %s125_s13  ;;  %p129_p10 = scmp.lt.u32.totalorder %s125_s13, %s208_s2 }
  0x36   :  { %p131_p11 = pnand %p129_p10, %p126_p9 }
  0x38   :  { %134 = shalt.err (!%p131_p11)
}
  0x39   :  { %57 = dma.vmem_to_hbm [thread:$0]  %s52_s10, 256, %s208_s2, [#allocation4], %s142_s19, %s142_s19, %s143_s20  }
  0x3a   :  { %139 = dma.done.wait [#allocation4], 256  }
  0x3b   :  { %140 = vsyncadd [#allocation4], 4294967040 }
  0x3c   :  { %61 = vsyncpa [#allocation3], 1 }
  0x3d   :  { %62 = vsyncpa [#allocation6], 1 }
  0x3e   :  { %63 = vsyncpa [#allocation4], 1 }

</bundles_post_ra>
